<compile_context>
chip_gen: v7x
topology: tpu7x:2x2x1
jax: 0.10.0
libtpu: 0.0.40
codegen_flags: <defaults>
</compile_context>

<pallas_src>
import functools

import numpy as np
import jax
import jax.numpy as jnp
from jax.experimental import pallas as pl
from jax.experimental.pallas import tpu as pltpu


# --------------------------- fused Down kernel --------------------------------

def _down_kernel(x_ref, pool_ref, mask_ref, w1_ref, b1_ref, w2_ref, b2_ref,
                 o_ref, *, shifts, slope, mxu_dtype):
    # x_ref    : (B_blk, Cin, H2*W2)        raw input block (channel rows, flat spatial lanes)
    # pool_ref : (B_blk, H2*W2, NF) f32     0.25-folded pooling/flatten selection matrices
    # mask_ref : (K*K, 1, NF)      f32      per-tap SAME-padding validity masks
    # w1_ref   : (K*K, Cout, Cin)           per-tap conv1 weights
    # b1_ref   : (Cout, 1)
    # w2_ref   : (K*K, Cout, Cout)          per-tap conv2 weights
    # b2_ref   : (Cout, 1)
    # o_ref    : (Cout, NF)                 final activation, NF = B_blk*Ho*Wo lanes
    B_blk = x_ref.shape[0]
    KK = len(shifts)

    # ---- 2x2 average pool + channel-major flatten: one matmul per sample.
    # conv_in[c, b*S + i*Wo + j] = mean of the 2x2 window -> already in the
    # lane-dense layout the convs consume (no reshape/transpose relayouts).
    conv_in = jnp.dot(x_ref[0].astype(jnp.float32), pool_ref[0],
                      preferred_element_type=jnp.float32)
    for b in range(1, B_blk):
        conv_in = conv_in + jnp.dot(x_ref[b].astype(jnp.float32), pool_ref[b],
                                    preferred_element_type=jnp.float32)

    # ---- conv as K*K accumulating matmuls on lane-rolled activations.
    # SAME zero-padding is folded into the per-tap masks.  pltpu.roll follows
    # jnp.roll semantics: out[p] = in[(p - shift) % NF], so shift = (-d) % NF
    # makes out[p] = in[p + d] for the tap's flat offset d.
    def conv(act, w_ref, b_ref):
        acc = None
        for t in range(KK):
            if shifts[t] == 0:
                shifted = act
            else:
                shifted = pltpu.roll(act, shift=shifts[t], axis=1)
            tap = jnp.dot(w_ref[t].astype(mxu_dtype),
                          (shifted * mask_ref[t]).astype(mxu_dtype),
                          preferred_element_type=jnp.float32)
            acc = tap if acc is None else acc + tap
        y = acc + b_ref[...].astype(jnp.float32)
        return jnp.maximum(y, slope * y)            # LeakyReLU(0.1)

    y1 = conv(conv_in, w1_ref, b1_ref)              # (Cout, NF)
    y2 = conv(y1, w2_ref, b2_ref)                   # (Cout, NF)
    o_ref[...] = y2.astype(o_ref.dtype)


def down_forward(params, x_nchw, *, mxu_dtype=jnp.float32, slope=0.1,
                 block_batch=None):
    """Fused AvgPool2d(2) -> Conv -> LeakyReLU -> Conv -> LeakyReLU (NCHW)."""
    N, Cin, H, W = x_nchw.shape
    Cout, _, K, _ = params["w1"].shape
    assert K % 2 == 1, "filterSize must be odd for SAME padding"
    pad = (K - 1) // 2

    # AvgPool2d(2) floors odd spatial dims, like PyTorch.
    H2, W2 = (H // 2) * 2, (W // 2) * 2
    Ho, Wo = H2 // 2, W2 // 2
    S = Ho * Wo
    HW = H2 * W2

    # Batch-block so the flattened (batch, spatial) lane axis is >= 128.
    if block_batch is None:
        block_batch = max(1, pl.cdiv(128, S))
    NF = block_batch * S
    n_blocks = pl.cdiv(N, block_batch)
    N_pad = n_blocks * block_batch

    # Crop + flatten are free reshapes; batch padding (if any) is zeros and
    # sliced off the output.
    x = x_nchw[:, :, :H2, :W2].reshape(N, Cin, HW)
    if N_pad != N:
        x = jnp.concatenate(
            [x, jnp.zeros((N_pad - N, Cin, HW), x.dtype)], axis=0)

    # ---------------- trace-time constants (numpy, baked once) ----------------
    # Pooling/flatten selection: pool[b, hw, q] = 0.25 iff input pixel hw of
    # sample b lies in the 2x2 window of flattened output position q.
    hw = np.arange(HW)
    pr = (hw // W2) // 2                       # pooled row of each input pixel
    pc = (hw % W2) // 2                        # pooled col of each input pixel
    q = np.arange(NF)
    qb, qp = q // S, q % S
    qi, qj = qp // Wo, qp % Wo
    spatial_sel = (pr[:, None] == qi[None, :]) & (pc[:, None] == qj[None, :])
    batch_sel = np.arange(block_batch)[:, None, None] == qb[None, None, :]
    pool_mat = (spatial_sel[None] & batch_sel).astype(np.float32) * np.float32(0.25)

    # Per-tap SAME-padding validity masks and lane-roll amounts (t = kh*K+kw).
    masks = np.zeros((K * K, 1, NF), np.float32)
    shifts = []
    for kh in range(K):
        for kw in range(K):
            t = kh * K + kw
            ii, jj = qi + kh - pad, qj + kw - pad
            masks[t, 0] = (ii >= 0) & (ii < Ho) & (jj >= 0) & (jj < Wo)
            d = (kh - pad) * Wo + (kw - pad)   # flat-index offset of this tap
            shifts.append((-d) % NF)

    # Per-tap weights: w_taps[kh*K + kw] = w[:, :, kh, kw]  -> (Cout, Cin).
    w1_t = jnp.transpose(params["w1"], (2, 3, 0, 1)).reshape(
        K * K, Cout, Cin).astype(mxu_dtype)
    w2_t = jnp.transpose(params["w2"], (2, 3, 0, 1)).reshape(
        K * K, Cout, Cout).astype(mxu_dtype)
    b1 = params["b1"].reshape(Cout, 1).astype(jnp.float32)
    b2 = params["b2"].reshape(Cout, 1).astype(jnp.float32)

    kernel = functools.partial(_down_kernel, shifts=tuple(shifts),
                               slope=slope, mxu_dtype=mxu_dtype)
    out = pl.pallas_call(
        kernel,
        out_shape=jax.ShapeDtypeStruct((Cout, N_pad * S), x_nchw.dtype),
        grid=(n_blocks,),
        in_specs=[
            pl.BlockSpec((block_batch, Cin, HW), lambda n: (n, 0, 0)),
            pl.BlockSpec((block_batch, HW, NF), lambda n: (0, 0, 0)),
            pl.BlockSpec((K * K, 1, NF), lambda n: (0, 0, 0)),
            pl.BlockSpec((K * K, Cout, Cin), lambda n: (0, 0, 0)),
            pl.BlockSpec((Cout, 1), lambda n: (0, 0)),
            pl.BlockSpec((K * K, Cout, Cout), lambda n: (0, 0, 0)),
            pl.BlockSpec((Cout, 1), lambda n: (0, 0)),
        ],
        out_specs=pl.BlockSpec((Cout, NF), lambda n: (0, n)),
        compiler_params=pltpu.CompilerParams(
            dimension_semantics=("parallel",)),
    )(x, jnp.asarray(pool_mat), jnp.asarray(masks), w1_t, b1, w2_t, b2)

    # (Cout, N_pad*S) -> (N, Cout, Ho, Wo): one cheap wrapper transpose.
    out = out.reshape(Cout, N_pad, Ho, Wo)
    return jnp.transpose(out, (1, 0, 2, 3))[:N]


# ------------------------------ params / reference ----------------------------

def init_down_params(key, in_channels, out_channels, filter_size):
    k1, k2, k3, k4 = jax.random.split(key, 4)
    s = 0.1
    return {
        "w1": s * jax.random.normal(
            k1, (out_channels, in_channels, filter_size, filter_size), jnp.float32),
        "b1": s * jax.random.normal(k2, (out_channels,), jnp.float32),
        "w2": s * jax.random.normal(
            k3, (out_channels, out_channels, filter_size, filter_size), jnp.float32),
        "b2": s * jax.random.normal(k4, (out_channels,), jnp.float32),
    }


def down_reference(params, x):
    """Pure-JAX reference (correctness check only)."""
    N, C, H, W = x.shape
    H2, W2 = (H // 2) * 2, (W // 2) * 2
    x = x[:, :, :H2, :W2]
    x = x.reshape(N, C, H2 // 2, 2, W2 // 2, 2).mean(axis=(3, 5))

    def conv(x, w, b):
        y = jax.lax.conv_general_dilated(
            x, w, window_strides=(1, 1), padding="SAME",
            dimension_numbers=("NCHW", "OIHW", "NCHW"))
        y = y + b.reshape(1, -1, 1, 1)
        return jnp.where(y >= 0, y, 0.1 * y)

    x = conv(x, params["w1"], params["b1"])
    x = conv(x, params["w2"], params["b2"])
    return x


if __name__ == "__main__":
    in_channels, out_channels, filter_size = 4, 8, 3
    N, H, W = 2, 16, 16

    key = jax.random.PRNGKey(0)
    pkey, xkey = jax.random.split(key)
    params = init_down_params(pkey, in_channels, out_channels, filter_size)
    x = jax.random.normal(xkey, (N, in_channels, H, W), jnp.float32)

    fwd = jax.jit(down_forward)
    out = jax.block_until_ready(fwd(params, x))
    assert out.shape == (N, out_channels, H // 2, W // 2), out.shape

    ref = down_reference(params, x)
    max_err = float(jnp.max(jnp.abs(out - ref)))
    if max_err > 1e-4:
        raise AssertionError(f"Pallas output mismatch vs reference: {max_err}")

    print("KERNEL_OK")
</pallas_src>

<mosaic_0001>
module attributes {stable_mosaic.version = 11 : i64} {
  func.func @_down_kernel(%arg0: i32, %arg1: memref<2x4x256xf32, #tpu.memory_space<vmem>>, %arg2: memref<2x256x128xf32, #tpu.memory_space<vmem>>, %arg3: memref<9x1x128xf32, #tpu.memory_space<vmem>>, %arg4: memref<9x8x4xf32, #tpu.memory_space<vmem>>, %arg5: memref<8x1xf32, #tpu.memory_space<vmem>>, %arg6: memref<9x8x8xf32, #tpu.memory_space<vmem>>, %arg7: memref<8x1xf32, #tpu.memory_space<vmem>>, %arg8: memref<8x128xf32, #tpu.memory_space<vmem>>) attributes {dimension_semantics = [#tpu.dimension_semantics<parallel>], iteration_bounds = array<i64: 1>, scalar_prefetch = 0 : i64, scratch_operands = 0 : i64, tpu.core_type = #tpu.core_type<tc>, window_params = [{transform_indices = @transform_0, window_bounds = array<i64: 2, 4, 256>}, {pipeline_mode = #tpu.pipeline_mode<synchronous>, transform_indices = @transform_1, window_bounds = array<i64: 2, 256, 128>}, {pipeline_mode = #tpu.pipeline_mode<synchronous>, transform_indices = @transform_2, window_bounds = array<i64: 9, 1, 128>}, {pipeline_mode = #tpu.pipeline_mode<synchronous>, transform_indices = @transform_3, window_bounds = array<i64: 9, 8, 4>}, {pipeline_mode = #tpu.pipeline_mode<synchronous>, transform_indices = @transform_4, window_bounds = array<i64: 8, 1>}, {pipeline_mode = #tpu.pipeline_mode<synchronous>, transform_indices = @transform_5, window_bounds = array<i64: 9, 8, 8>}, {pipeline_mode = #tpu.pipeline_mode<synchronous>, transform_indices = @transform_6, window_bounds = array<i64: 8, 1>}, {transform_indices = @transform_7, window_bounds = array<i64: 8, 128>}]} {
    %c0 = arith.constant 0 : index
    %c0_0 = arith.constant 0 : index
    %c0_1 = arith.constant 0 : index
    %0 = vector.load %arg1[%c0, %c0_0, %c0_1] : memref<2x4x256xf32, #tpu.memory_space<vmem>>, vector<1x4x256xf32>
    %1 = vector.shape_cast %0 : vector<1x4x256xf32> to vector<4x256xf32>
    %c0_2 = arith.constant 0 : index
    %c0_3 = arith.constant 0 : index
    %c0_4 = arith.constant 0 : index
    %2 = vector.load %arg2[%c0_2, %c0_3, %c0_4] : memref<2x256x128xf32, #tpu.memory_space<vmem>>, vector<1x256x128xf32>
    %3 = vector.shape_cast %2 : vector<1x256x128xf32> to vector<256x128xf32>
    %cst = arith.constant dense<0.000000e+00> : vector<4x128xf32>
    %4 = tpu.matmul %1, %3, %cst {dimension_numbers = #tpu.dot_dimension_numbers<[1], [0], [0], [1], [0, 0, 1, 1], [], []>} : vector<4x256xf32>, vector<256x128xf32>, vector<4x128xf32> -> vector<4x128xf32>
    %c1 = arith.constant 1 : index
    %c0_5 = arith.constant 0 : index
    %c0_6 = arith.constant 0 : index
    %5 = vector.load %arg1[%c1, %c0_5, %c0_6] : memref<2x4x256xf32, #tpu.memory_space<vmem>>, vector<1x4x256xf32>
    %6 = vector.shape_cast %5 : vector<1x4x256xf32> to vector<4x256xf32>
    %c1_7 = arith.constant 1 : index
    %c0_8 = arith.constant 0 : index
    %c0_9 = arith.constant 0 : index
    %7 = vector.load %arg2[%c1_7, %c0_8, %c0_9] : memref<2x256x128xf32, #tpu.memory_space<vmem>>, vector<1x256x128xf32>
    %8 = vector.shape_cast %7 : vector<1x256x128xf32> to vector<256x128xf32>
    %cst_10 = arith.constant dense<0.000000e+00> : vector<4x128xf32>
    %9 = tpu.matmul %6, %8, %cst_10 {dimension_numbers = #tpu.dot_dimension_numbers<[1], [0], [0], [1], [0, 0, 1, 1], [], []>} : vector<4x256xf32>, vector<256x128xf32>, vector<4x128xf32> -> vector<4x128xf32>
    %10 = arith.addf %4, %9 : vector<4x128xf32>
    %c9_i32 = arith.constant 9 : i32
    %11 = tpu.dynamic_rotate %10 by %c9_i32 dim 1 : vector<4x128xf32>, i32 -> vector<4x128xf32>
    %c0_11 = arith.constant 0 : index
    %c0_12 = arith.constant 0 : index
    %c0_13 = arith.constant 0 : index
    %12 = vector.load %arg4[%c0_11, %c0_12, %c0_13] : memref<9x8x4xf32, #tpu.memory_space<vmem>>, vector<1x8x4xf32>
    %13 = vector.shape_cast %12 : vector<1x8x4xf32> to vector<8x4xf32>
    %c0_14 = arith.constant 0 : index
    %c0_15 = arith.constant 0 : index
    %c0_16 = arith.constant 0 : index
    %14 = vector.load %arg3[%c0_14, %c0_15, %c0_16] : memref<9x1x128xf32, #tpu.memory_space<vmem>>, vector<1x1x128xf32>
    %15 = vector.shape_cast %14 : vector<1x1x128xf32> to vector<1x128xf32>
    %16 = vector.broadcast %15 : vector<1x128xf32> to vector<4x128xf32>
    %17 = arith.mulf %11, %16 : vector<4x128xf32>
    %cst_17 = arith.constant dense<0.000000e+00> : vector<8x128xf32>
    %18 = tpu.matmul %13, %17, %cst_17 {dimension_numbers = #tpu.dot_dimension_numbers<[1], [0], [0], [1], [0, 0, 1, 1], [], []>} : vector<8x4xf32>, vector<4x128xf32>, vector<8x128xf32> -> vector<8x128xf32>
    %c8_i32 = arith.constant 8 : i32
    %19 = tpu.dynamic_rotate %10 by %c8_i32 dim 1 : vector<4x128xf32>, i32 -> vector<4x128xf32>
    %c1_18 = arith.constant 1 : index
    %c0_19 = arith.constant 0 : index
    %c0_20 = arith.constant 0 : index
    %20 = vector.load %arg4[%c1_18, %c0_19, %c0_20] : memref<9x8x4xf32, #tpu.memory_space<vmem>>, vector<1x8x4xf32>
    %21 = vector.shape_cast %20 : vector<1x8x4xf32> to vector<8x4xf32>
    %c1_21 = arith.constant 1 : index
    %c0_22 = arith.constant 0 : index
    %c0_23 = arith.constant 0 : index
    %22 = vector.load %arg3[%c1_21, %c0_22, %c0_23] : memref<9x1x128xf32, #tpu.memory_space<vmem>>, vector<1x1x128xf32>
    %23 = vector.shape_cast %22 : vector<1x1x128xf32> to vector<1x128xf32>
    %24 = vector.broadcast %23 : vector<1x128xf32> to vector<4x128xf32>
    %25 = arith.mulf %19, %24 : vector<4x128xf32>
    %cst_24 = arith.constant dense<0.000000e+00> : vector<8x128xf32>
    %26 = tpu.matmul %21, %25, %cst_24 {dimension_numbers = #tpu.dot_dimension_numbers<[1], [0], [0], [1], [0, 0, 1, 1], [], []>} : vector<8x4xf32>, vector<4x128xf32>, vector<8x128xf32> -> vector<8x128xf32>
    %27 = arith.addf %18, %26 : vector<8x128xf32>
    %c7_i32 = arith.constant 7 : i32
    %28 = tpu.dynamic_rotate %10 by %c7_i32 dim 1 : vector<4x128xf32>, i32 -> vector<4x128xf32>
    %c2 = arith.constant 2 : index
    %c0_25 = arith.constant 0 : index
    %c0_26 = arith.constant 0 : index
    %29 = vector.load %arg4[%c2, %c0_25, %c0_26] : memref<9x8x4xf32, #tpu.memory_space<vmem>>, vector<1x8x4xf32>
    %30 = vector.shape_cast %29 : vector<1x8x4xf32> to vector<8x4xf32>
    %c2_27 = arith.constant 2 : index
    %c0_28 = arith.constant 0 : index
    %c0_29 = arith.constant 0 : index
    %31 = vector.load %arg3[%c2_27, %c0_28, %c0_29] : memref<9x1x128xf32, #tpu.memory_space<vmem>>, vector<1x1x128xf32>
    %32 = vector.shape_cast %31 : vector<1x1x128xf32> to vector<1x128xf32>
    %33 = vector.broadcast %32 : vector<1x128xf32> to vector<4x128xf32>
    %34 = arith.mulf %28, %33 : vector<4x128xf32>
    %cst_30 = arith.constant dense<0.000000e+00> : vector<8x128xf32>
    %35 = tpu.matmul %30, %34, %cst_30 {dimension_numbers = #tpu.dot_dimension_numbers<[1], [0], [0], [1], [0, 0, 1, 1], [], []>} : vector<8x4xf32>, vector<4x128xf32>, vector<8x128xf32> -> vector<8x128xf32>
    %36 = arith.addf %27, %35 : vector<8x128xf32>
    %c1_i32 = arith.constant 1 : i32
    %37 = tpu.dynamic_rotate %10 by %c1_i32 dim 1 : vector<4x128xf32>, i32 -> vector<4x128xf32>
    %c3 = arith.constant 3 : index
    %c0_31 = arith.constant 0 : index
    %c0_32 = arith.constant 0 : index
    %38 = vector.load %arg4[%c3, %c0_31, %c0_32] : memref<9x8x4xf32, #tpu.memory_space<vmem>>, vector<1x8x4xf32>
    %39 = vector.shape_cast %38 : vector<1x8x4xf32> to vector<8x4xf32>
    %c3_33 = arith.constant 3 : index
    %c0_34 = arith.constant 0 : index
    %c0_35 = arith.constant 0 : index
    %40 = vector.load %arg3[%c3_33, %c0_34, %c0_35] : memref<9x1x128xf32, #tpu.memory_space<vmem>>, vector<1x1x128xf32>
    %41 = vector.shape_cast %40 : vector<1x1x128xf32> to vector<1x128xf32>
    %42 = vector.broadcast %41 : vector<1x128xf32> to vector<4x128xf32>
    %43 = arith.mulf %37, %42 : vector<4x128xf32>
    %cst_36 = arith.constant dense<0.000000e+00> : vector<8x128xf32>
    %44 = tpu.matmul %39, %43, %cst_36 {dimension_numbers = #tpu.dot_dimension_numbers<[1], [0], [0], [1], [0, 0, 1, 1], [], []>} : vector<8x4xf32>, vector<4x128xf32>, vector<8x128xf32> -> vector<8x128xf32>
    %45 = arith.addf %36, %44 : vector<8x128xf32>
    %c4 = arith.constant 4 : index
    %c0_37 = arith.constant 0 : index
    %c0_38 = arith.constant 0 : index
    %46 = vector.load %arg4[%c4, %c0_37, %c0_38] : memref<9x8x4xf32, #tpu.memory_space<vmem>>, vector<1x8x4xf32>
    %47 = vector.shape_cast %46 : vector<1x8x4xf32> to vector<8x4xf32>
    %c4_39 = arith.constant 4 : index
    %c0_40 = arith.constant 0 : index
    %c0_41 = arith.constant 0 : index
    %48 = vector.load %arg3[%c4_39, %c0_40, %c0_41] : memref<9x1x128xf32, #tpu.memory_space<vmem>>, vector<1x1x128xf32>
    %49 = vector.shape_cast %48 : vector<1x1x128xf32> to vector<1x128xf32>
    %50 = vector.broadcast %49 : vector<1x128xf32> to vector<4x128xf32>
    %51 = arith.mulf %10, %50 : vector<4x128xf32>
    %cst_42 = arith.constant dense<0.000000e+00> : vector<8x128xf32>
    %52 = tpu.matmul %47, %51, %cst_42 {dimension_numbers = #tpu.dot_dimension_numbers<[1], [0], [0], [1], [0, 0, 1, 1], [], []>} : vector<8x4xf32>, vector<4x128xf32>, vector<8x128xf32> -> vector<8x128xf32>
    %53 = arith.addf %45, %52 : vector<8x128xf32>
    %c127_i32 = arith.constant 127 : i32
    %54 = tpu.dynamic_rotate %10 by %c127_i32 dim 1 : vector<4x128xf32>, i32 -> vector<4x128xf32>
    %c5 = arith.constant 5 : index
    %c0_43 = arith.constant 0 : index
    %c0_44 = arith.constant 0 : index
    %55 = vector.load %arg4[%c5, %c0_43, %c0_44] : memref<9x8x4xf32, #tpu.memory_space<vmem>>, vector<1x8x4xf32>
    %56 = vector.shape_cast %55 : vector<1x8x4xf32> to vector<8x4xf32>
    %c5_45 = arith.constant 5 : index
    %c0_46 = arith.constant 0 : index
    %c0_47 = arith.constant 0 : index
    %57 = vector.load %arg3[%c5_45, %c0_46, %c0_47] : memref<9x1x128xf32, #tpu.memory_space<vmem>>, vector<1x1x128xf32>
    %58 = vector.shape_cast %57 : vector<1x1x128xf32> to vector<1x128xf32>
    %59 = vector.broadcast %58 : vector<1x128xf32> to vector<4x128xf32>
    %60 = arith.mulf %54, %59 : vector<4x128xf32>
    %cst_48 = arith.constant dense<0.000000e+00> : vector<8x128xf32>
    %61 = tpu.matmul %56, %60, %cst_48 {dimension_numbers = #tpu.dot_dimension_numbers<[1], [0], [0], [1], [0, 0, 1, 1], [], []>} : vector<8x4xf32>, vector<4x128xf32>, vector<8x128xf32> -> vector<8x128xf32>
    %62 = arith.addf %53, %61 : vector<8x128xf32>
    %c121_i32 = arith.constant 121 : i32
    %63 = tpu.dynamic_rotate %10 by %c121_i32 dim 1 : vector<4x128xf32>, i32 -> vector<4x128xf32>
    %c6 = arith.constant 6 : index
    %c0_49 = arith.constant 0 : index
    %c0_50 = arith.constant 0 : index
    %64 = vector.load %arg4[%c6, %c0_49, %c0_50] : memref<9x8x4xf32, #tpu.memory_space<vmem>>, vector<1x8x4xf32>
    %65 = vector.shape_cast %64 : vector<1x8x4xf32> to vector<8x4xf32>
    %c6_51 = arith.constant 6 : index
    %c0_52 = arith.constant 0 : index
    %c0_53 = arith.constant 0 : index
    %66 = vector.load %arg3[%c6_51, %c0_52, %c0_53] : memref<9x1x128xf32, #tpu.memory_space<vmem>>, vector<1x1x128xf32>
    %67 = vector.shape_cast %66 : vector<1x1x128xf32> to vector<1x128xf32>
    %68 = vector.broadcast %67 : vector<1x128xf32> to vector<4x128xf32>
    %69 = arith.mulf %63, %68 : vector<4x128xf32>
    %cst_54 = arith.constant dense<0.000000e+00> : vector<8x128xf32>
    %70 = tpu.matmul %65, %69, %cst_54 {dimension_numbers = #tpu.dot_dimension_numbers<[1], [0], [0], [1], [0, 0, 1, 1], [], []>} : vector<8x4xf32>, vector<4x128xf32>, vector<8x128xf32> -> vector<8x128xf32>
    %71 = arith.addf %62, %70 : vector<8x128xf32>
    %c120_i32 = arith.constant 120 : i32
    %72 = tpu.dynamic_rotate %10 by %c120_i32 dim 1 : vector<4x128xf32>, i32 -> vector<4x128xf32>
    %c7 = arith.constant 7 : index
    %c0_55 = arith.constant 0 : index
    %c0_56 = arith.constant 0 : index
    %73 = vector.load %arg4[%c7, %c0_55, %c0_56] : memref<9x8x4xf32, #tpu.memory_space<vmem>>, vector<1x8x4xf32>
    %74 = vector.shape_cast %73 : vector<1x8x4xf32> to vector<8x4xf32>
    %c7_57 = arith.constant 7 : index
    %c0_58 = arith.constant 0 : index
    %c0_59 = arith.constant 0 : index
    %75 = vector.load %arg3[%c7_57, %c0_58, %c0_59] : memref<9x1x128xf32, #tpu.memory_space<vmem>>, vector<1x1x128xf32>
    %76 = vector.shape_cast %75 : vector<1x1x128xf32> to vector<1x128xf32>
    %77 = vector.broadcast %76 : vector<1x128xf32> to vector<4x128xf32>
    %78 = arith.mulf %72, %77 : vector<4x128xf32>
    %cst_60 = arith.constant dense<0.000000e+00> : vector<8x128xf32>
    %79 = tpu.matmul %74, %78, %cst_60 {dimension_numbers = #tpu.dot_dimension_numbers<[1], [0], [0], [1], [0, 0, 1, 1], [], []>} : vector<8x4xf32>, vector<4x128xf32>, vector<8x128xf32> -> vector<8x128xf32>
    %80 = arith.addf %71, %79 : vector<8x128xf32>
    %c119_i32 = arith.constant 119 : i32
    %81 = tpu.dynamic_rotate %10 by %c119_i32 dim 1 : vector<4x128xf32>, i32 -> vector<4x128xf32>
    %c8 = arith.constant 8 : index
    %c0_61 = arith.constant 0 : index
    %c0_62 = arith.constant 0 : index
    %82 = vector.load %arg4[%c8, %c0_61, %c0_62] : memref<9x8x4xf32, #tpu.memory_space<vmem>>, vector<1x8x4xf32>
    %83 = vector.shape_cast %82 : vector<1x8x4xf32> to vector<8x4xf32>
    %c8_63 = arith.constant 8 : index
    %c0_64 = arith.constant 0 : index
    %c0_65 = arith.constant 0 : index
    %84 = vector.load %arg3[%c8_63, %c0_64, %c0_65] : memref<9x1x128xf32, #tpu.memory_space<vmem>>, vector<1x1x128xf32>
    %85 = vector.shape_cast %84 : vector<1x1x128xf32> to vector<1x128xf32>
    %86 = vector.broadcast %85 : vector<1x128xf32> to vector<4x128xf32>
    %87 = arith.mulf %81, %86 : vector<4x128xf32>
    %cst_66 = arith.constant dense<0.000000e+00> : vector<8x128xf32>
    %88 = tpu.matmul %83, %87, %cst_66 {dimension_numbers = #tpu.dot_dimension_numbers<[1], [0], [0], [1], [0, 0, 1, 1], [], []>} : vector<8x4xf32>, vector<4x128xf32>, vector<8x128xf32> -> vector<8x128xf32>
    %89 = arith.addf %80, %88 : vector<8x128xf32>
    %c0_67 = arith.constant 0 : index
    %c0_68 = arith.constant 0 : index
    %90 = vector.load %arg5[%c0_67, %c0_68] : memref<8x1xf32, #tpu.memory_space<vmem>>, vector<8x1xf32>
    %91 = vector.broadcast %90 : vector<8x1xf32> to vector<8x128xf32>
    %92 = arith.addf %89, %91 : vector<8x128xf32>
    %cst_69 = arith.constant 1.000000e-01 : f32
    %93 = vector.broadcast %cst_69 : f32 to vector<8x128xf32>
    %94 = arith.mulf %93, %92 : vector<8x128xf32>
    %95 = arith.maximumf %92, %94 : vector<8x128xf32>
    %c9_i32_70 = arith.constant 9 : i32
    %96 = tpu.dynamic_rotate %95 by %c9_i32_70 dim 1 : vector<8x128xf32>, i32 -> vector<8x128xf32>
    %c0_71 = arith.constant 0 : index
    %c0_72 = arith.constant 0 : index
    %c0_73 = arith.constant 0 : index
    %97 = vector.load %arg6[%c0_71, %c0_72, %c0_73] : memref<9x8x8xf32, #tpu.memory_space<vmem>>, vector<1x8x8xf32>
    %98 = vector.shape_cast %97 : vector<1x8x8xf32> to vector<8x8xf32>
    %c0_74 = arith.constant 0 : index
    %c0_75 = arith.constant 0 : index
    %c0_76 = arith.constant 0 : index
    %99 = vector.load %arg3[%c0_74, %c0_75, %c0_76] : memref<9x1x128xf32, #tpu.memory_space<vmem>>, vector<1x1x128xf32>
    %100 = vector.shape_cast %99 : vector<1x1x128xf32> to vector<1x128xf32>
    %101 = vector.broadcast %100 : vector<1x128xf32> to vector<8x128xf32>
    %102 = arith.mulf %96, %101 : vector<8x128xf32>
    %cst_77 = arith.constant dense<0.000000e+00> : vector<8x128xf32>
    %103 = tpu.matmul %98, %102, %cst_77 {dimension_numbers = #tpu.dot_dimension_numbers<[1], [0], [0], [1], [0, 0, 1, 1], [], []>} : vector<8x8xf32>, vector<8x128xf32>, vector<8x128xf32> -> vector<8x128xf32>
    %c8_i32_78 = arith.constant 8 : i32
    %104 = tpu.dynamic_rotate %95 by %c8_i32_78 dim 1 : vector<8x128xf32>, i32 -> vector<8x128xf32>
    %c1_79 = arith.constant 1 : index
    %c0_80 = arith.constant 0 : index
    %c0_81 = arith.constant 0 : index
    %105 = vector.load %arg6[%c1_79, %c0_80, %c0_81] : memref<9x8x8xf32, #tpu.memory_space<vmem>>, vector<1x8x8xf32>
    %106 = vector.shape_cast %105 : vector<1x8x8xf32> to vector<8x8xf32>
    %c1_82 = arith.constant 1 : index
    %c0_83 = arith.constant 0 : index
    %c0_84 = arith.constant 0 : index
    %107 = vector.load %arg3[%c1_82, %c0_83, %c0_84] : memref<9x1x128xf32, #tpu.memory_space<vmem>>, vector<1x1x128xf32>
    %108 = vector.shape_cast %107 : vector<1x1x128xf32> to vector<1x128xf32>
    %109 = vector.broadcast %108 : vector<1x128xf32> to vector<8x128xf32>
    %110 = arith.mulf %104, %109 : vector<8x128xf32>
    %cst_85 = arith.constant dense<0.000000e+00> : vector<8x128xf32>
    %111 = tpu.matmul %106, %110, %cst_85 {dimension_numbers = #tpu.dot_dimension_numbers<[1], [0], [0], [1], [0, 0, 1, 1], [], []>} : vector<8x8xf32>, vector<8x128xf32>, vector<8x128xf32> -> vector<8x128xf32>
    %112 = arith.addf %103, %111 : vector<8x128xf32>
    %c7_i32_86 = arith.constant 7 : i32
    %113 = tpu.dynamic_rotate %95 by %c7_i32_86 dim 1 : vector<8x128xf32>, i32 -> vector<8x128xf32>
    %c2_87 = arith.constant 2 : index
    %c0_88 = arith.constant 0 : index
    %c0_89 = arith.constant 0 : index
    %114 = vector.load %arg6[%c2_87, %c0_88, %c0_89] : memref<9x8x8xf32, #tpu.memory_space<vmem>>, vector<1x8x8xf32>
    %115 = vector.shape_cast %114 : vector<1x8x8xf32> to vector<8x8xf32>
    %c2_90 = arith.constant 2 : index
    %c0_91 = arith.constant 0 : index
    %c0_92 = arith.constant 0 : index
    %116 = vector.load %arg3[%c2_90, %c0_91, %c0_92] : memref<9x1x128xf32, #tpu.memory_space<vmem>>, vector<1x1x128xf32>
    %117 = vector.shape_cast %116 : vector<1x1x128xf32> to vector<1x128xf32>
    %118 = vector.broadcast %117 : vector<1x128xf32> to vector<8x128xf32>
    %119 = arith.mulf %113, %118 : vector<8x128xf32>
    %cst_93 = arith.constant dense<0.000000e+00> : vector<8x128xf32>
    %120 = tpu.matmul %115, %119, %cst_93 {dimension_numbers = #tpu.dot_dimension_numbers<[1], [0], [0], [1], [0, 0, 1, 1], [], []>} : vector<8x8xf32>, vector<8x128xf32>, vector<8x128xf32> -> vector<8x128xf32>
    %121 = arith.addf %112, %120 : vector<8x128xf32>
    %c1_i32_94 = arith.constant 1 : i32
    %122 = tpu.dynamic_rotate %95 by %c1_i32_94 dim 1 : vector<8x128xf32>, i32 -> vector<8x128xf32>
    %c3_95 = arith.constant 3 : index
    %c0_96 = arith.constant 0 : index
    %c0_97 = arith.constant 0 : index
    %123 = vector.load %arg6[%c3_95, %c0_96, %c0_97] : memref<9x8x8xf32, #tpu.memory_space<vmem>>, vector<1x8x8xf32>
    %124 = vector.shape_cast %123 : vector<1x8x8xf32> to vector<8x8xf32>
    %c3_98 = arith.constant 3 : index
    %c0_99 = arith.constant 0 : index
    %c0_100 = arith.constant 0 : index
    %125 = vector.load %arg3[%c3_98, %c0_99, %c0_100] : memref<9x1x128xf32, #tpu.memory_space<vmem>>, vector<1x1x128xf32>
    %126 = vector.shape_cast %125 : vector<1x1x128xf32> to vector<1x128xf32>
    %127 = vector.broadcast %126 : vector<1x128xf32> to vector<8x128xf32>
    %128 = arith.mulf %122, %127 : vector<8x128xf32>
    %cst_101 = arith.constant dense<0.000000e+00> : vector<8x128xf32>
    %129 = tpu.matmul %124, %128, %cst_101 {dimension_numbers = #tpu.dot_dimension_numbers<[1], [0], [0], [1], [0, 0, 1, 1], [], []>} : vector<8x8xf32>, vector<8x128xf32>, vector<8x128xf32> -> vector<8x128xf32>
    %130 = arith.addf %121, %129 : vector<8x128xf32>
    %c4_102 = arith.constant 4 : index
    %c0_103 = arith.constant 0 : index
    %c0_104 = arith.constant 0 : index
    %131 = vector.load %arg6[%c4_102, %c0_103, %c0_104] : memref<9x8x8xf32, #tpu.memory_space<vmem>>, vector<1x8x8xf32>
    %132 = vector.shape_cast %131 : vector<1x8x8xf32> to vector<8x8xf32>
    %c4_105 = arith.constant 4 : index
    %c0_106 = arith.constant 0 : index
    %c0_107 = arith.constant 0 : index
    %133 = vector.load %arg3[%c4_105, %c0_106, %c0_107] : memref<9x1x128xf32, #tpu.memory_space<vmem>>, vector<1x1x128xf32>
    %134 = vector.shape_cast %133 : vector<1x1x128xf32> to vector<1x128xf32>
    %135 = vector.broadcast %134 : vector<1x128xf32> to vector<8x128xf32>
    %136 = arith.mulf %95, %135 : vector<8x128xf32>
    %cst_108 = arith.constant dense<0.000000e+00> : vector<8x128xf32>
    %137 = tpu.matmul %132, %136, %cst_108 {dimension_numbers = #tpu.dot_dimension_numbers<[1], [0], [0], [1], [0, 0, 1, 1], [], []>} : vector<8x8xf32>, vector<8x128xf32>, vector<8x128xf32> -> vector<8x128xf32>
    %138 = arith.addf %130, %137 : vector<8x128xf32>
    %c127_i32_109 = arith.constant 127 : i32
    %139 = tpu.dynamic_rotate %95 by %c127_i32_109 dim 1 : vector<8x128xf32>, i32 -> vector<8x128xf32>
    %c5_110 = arith.constant 5 : index
    %c0_111 = arith.constant 0 : index
    %c0_112 = arith.constant 0 : index
    %140 = vector.load %arg6[%c5_110, %c0_111, %c0_112] : memref<9x8x8xf32, #tpu.memory_space<vmem>>, vector<1x8x8xf32>
    %141 = vector.shape_cast %140 : vector<1x8x8xf32> to vector<8x8xf32>
    %c5_113 = arith.constant 5 : index
    %c0_114 = arith.constant 0 : index
    %c0_115 = arith.constant 0 : index
    %142 = vector.load %arg3[%c5_113, %c0_114, %c0_115] : memref<9x1x128xf32, #tpu.memory_space<vmem>>, vector<1x1x128xf32>
    %143 = vector.shape_cast %142 : vector<1x1x128xf32> to vector<1x128xf32>
    %144 = vector.broadcast %143 : vector<1x128xf32> to vector<8x128xf32>
    %145 = arith.mulf %139, %144 : vector<8x128xf32>
    %cst_116 = arith.constant dense<0.000000e+00> : vector<8x128xf32>
    %146 = tpu.matmul %141, %145, %cst_116 {dimension_numbers = #tpu.dot_dimension_numbers<[1], [0], [0], [1], [0, 0, 1, 1], [], []>} : vector<8x8xf32>, vector<8x128xf32>, vector<8x128xf32> -> vector<8x128xf32>
    %147 = arith.addf %138, %146 : vector<8x128xf32>
    %c121_i32_117 = arith.constant 121 : i32
    %148 = tpu.dynamic_rotate %95 by %c121_i32_117 dim 1 : vector<8x128xf32>, i32 -> vector<8x128xf32>
    %c6_118 = arith.constant 6 : index
    %c0_119 = arith.constant 0 : index
    %c0_120 = arith.constant 0 : index
    %149 = vector.load %arg6[%c6_118, %c0_119, %c0_120] : memref<9x8x8xf32, #tpu.memory_space<vmem>>, vector<1x8x8xf32>
    %150 = vector.shape_cast %149 : vector<1x8x8xf32> to vector<8x8xf32>
    %c6_121 = arith.constant 6 : index
    %c0_122 = arith.constant 0 : index
    %c0_123 = arith.constant 0 : index
    %151 = vector.load %arg3[%c6_121, %c0_122, %c0_123] : memref<9x1x128xf32, #tpu.memory_space<vmem>>, vector<1x1x128xf32>
    %152 = vector.shape_cast %151 : vector<1x1x128xf32> to vector<1x128xf32>
    %153 = vector.broadcast %152 : vector<1x128xf32> to vector<8x128xf32>
    %154 = arith.mulf %148, %153 : vector<8x128xf32>
    %cst_124 = arith.constant dense<0.000000e+00> : vector<8x128xf32>
    %155 = tpu.matmul %150, %154, %cst_124 {dimension_numbers = #tpu.dot_dimension_numbers<[1], [0], [0], [1], [0, 0, 1, 1], [], []>} : vector<8x8xf32>, vector<8x128xf32>, vector<8x128xf32> -> vector<8x128xf32>
    %156 = arith.addf %147, %155 : vector<8x128xf32>
    %c120_i32_125 = arith.constant 120 : i32
    %157 = tpu.dynamic_rotate %95 by %c120_i32_125 dim 1 : vector<8x128xf32>, i32 -> vector<8x128xf32>
    %c7_126 = arith.constant 7 : index
    %c0_127 = arith.constant 0 : index
    %c0_128 = arith.constant 0 : index
    %158 = vector.load %arg6[%c7_126, %c0_127, %c0_128] : memref<9x8x8xf32, #tpu.memory_space<vmem>>, vector<1x8x8xf32>
    %159 = vector.shape_cast %158 : vector<1x8x8xf32> to vector<8x8xf32>
    %c7_129 = arith.constant 7 : index
    %c0_130 = arith.constant 0 : index
    %c0_131 = arith.constant 0 : index
    %160 = vector.load %arg3[%c7_129, %c0_130, %c0_131] : memref<9x1x128xf32, #tpu.memory_space<vmem>>, vector<1x1x128xf32>
    %161 = vector.shape_cast %160 : vector<1x1x128xf32> to vector<1x128xf32>
    %162 = vector.broadcast %161 : vector<1x128xf32> to vector<8x128xf32>
    %163 = arith.mulf %157, %162 : vector<8x128xf32>
    %cst_132 = arith.constant dense<0.000000e+00> : vector<8x128xf32>
    %164 = tpu.matmul %159, %163, %cst_132 {dimension_numbers = #tpu.dot_dimension_numbers<[1], [0], [0], [1], [0, 0, 1, 1], [], []>} : vector<8x8xf32>, vector<8x128xf32>, vector<8x128xf32> -> vector<8x128xf32>
    %165 = arith.addf %156, %164 : vector<8x128xf32>
    %c119_i32_133 = arith.constant 119 : i32
    %166 = tpu.dynamic_rotate %95 by %c119_i32_133 dim 1 : vector<8x128xf32>, i32 -> vector<8x128xf32>
    %c8_134 = arith.constant 8 : index
    %c0_135 = arith.constant 0 : index
    %c0_136 = arith.constant 0 : index
    %167 = vector.load %arg6[%c8_134, %c0_135, %c0_136] : memref<9x8x8xf32, #tpu.memory_space<vmem>>, vector<1x8x8xf32>
    %168 = vector.shape_cast %167 : vector<1x8x8xf32> to vector<8x8xf32>
    %c8_137 = arith.constant 8 : index
    %c0_138 = arith.constant 0 : index
    %c0_139 = arith.constant 0 : index
    %169 = vector.load %arg3[%c8_137, %c0_138, %c0_139] : memref<9x1x128xf32, #tpu.memory_space<vmem>>, vector<1x1x128xf32>
    %170 = vector.shape_cast %169 : vector<1x1x128xf32> to vector<1x128xf32>
    %171 = vector.broadcast %170 : vector<1x128xf32> to vector<8x128xf32>
    %172 = arith.mulf %166, %171 : vector<8x128xf32>
    %cst_140 = arith.constant dense<0.000000e+00> : vector<8x128xf32>
    %173 = tpu.matmul %168, %172, %cst_140 {dimension_numbers = #tpu.dot_dimension_numbers<[1], [0], [0], [1], [0, 0, 1, 1], [], []>} : vector<8x8xf32>, vector<8x128xf32>, vector<8x128xf32> -> vector<8x128xf32>
    %174 = arith.addf %165, %173 : vector<8x128xf32>
    %c0_141 = arith.constant 0 : index
    %c0_142 = arith.constant 0 : index
    %175 = vector.load %arg7[%c0_141, %c0_142] : memref<8x1xf32, #tpu.memory_space<vmem>>, vector<8x1xf32>
    %176 = vector.broadcast %175 : vector<8x1xf32> to vector<8x128xf32>
    %177 = arith.addf %174, %176 : vector<8x128xf32>
    %cst_143 = arith.constant 1.000000e-01 : f32
    %178 = vector.broadcast %cst_143 : f32 to vector<8x128xf32>
    %179 = arith.mulf %178, %177 : vector<8x128xf32>
    %180 = arith.maximumf %177, %179 : vector<8x128xf32>
    %c0_144 = arith.constant 0 : index
    %c0_145 = arith.constant 0 : index
    %181 = vector.load %arg8[%c0_144, %c0_145] : memref<8x128xf32, #tpu.memory_space<vmem>>, vector<8x128xf32>
    tpu.vector_store %arg8[%c0_144, %c0_145], %180 {strides = array<i32>} : memref<8x128xf32, #tpu.memory_space<vmem>>, vector<8x128xf32>,
    return
  }
  func.func @transform_0(%arg0: i32) -> (i32, i32, i32) {
    %c0_i32 = arith.constant 0 : i32
    %c0_i32_0 = arith.constant 0 : i32
    %c0_i32_1 = arith.constant 0 : i32
    return %arg0, %c0_i32, %c0_i32_0 : i32, i32, i32
  }
  func.func @transform_1(%arg0: i32) -> (i32, i32, i32) {
    %c0_i32 = arith.constant 0 : i32
    %c0_i32_0 = arith.constant 0 : i32
    %c0_i32_1 = arith.constant 0 : i32
    %c0_i32_2 = arith.constant 0 : i32
    return %c0_i32, %c0_i32_0, %c0_i32_1 : i32, i32, i32
  }
  func.func @transform_2(%arg0: i32) -> (i32, i32, i32) {
    %c0_i32 = arith.constant 0 : i32
    %c0_i32_0 = arith.constant 0 : i32
    %c0_i32_1 = arith.constant 0 : i32
    %c0_i32_2 = arith.constant 0 : i32
    return %c0_i32, %c0_i32_0, %c0_i32_1 : i32, i32, i32
  }
  func.func @transform_3(%arg0: i32) -> (i32, i32, i32) {
    %c0_i32 = arith.constant 0 : i32
    %c0_i32_0 = arith.constant 0 : i32
    %c0_i32_1 = arith.constant 0 : i32
    %c0_i32_2 = arith.constant 0 : i32
    return %c0_i32, %c0_i32_0, %c0_i32_1 : i32, i32, i32
  }
  func.func @transform_4(%arg0: i32) -> (i32, i32) {
    %c0_i32 = arith.constant 0 : i32
    %c0_i32_0 = arith.constant 0 : i32
    %c0_i32_1 = arith.constant 0 : i32
    return %c0_i32, %c0_i32_0 : i32, i32
  }
  func.func @transform_5(%arg0: i32) -> (i32, i32, i32) {
    %c0_i32 = arith.constant 0 : i32
    %c0_i32_0 = arith.constant 0 : i32
    %c0_i32_1 = arith.constant 0 : i32
    %c0_i32_2 = arith.constant 0 : i32
    return %c0_i32, %c0_i32_0, %c0_i32_1 : i32, i32, i32
  }
  func.func @transform_6(%arg0: i32) -> (i32, i32) {
    %c0_i32 = arith.constant 0 : i32
    %c0_i32_0 = arith.constant 0 : i32
    %c0_i32_1 = arith.constant 0 : i32
    return %c0_i32, %c0_i32_0 : i32, i32
  }
  func.func @transform_7(%arg0: i32) -> (i32, i32) {
    %c0_i32 = arith.constant 0 : i32
    %c0_i32_0 = arith.constant 0 : i32
    return %c0_i32, %arg0 : i32, i32
  }
}

</mosaic_0001>

<bundles_post_ra>
// kernel: down_forward.1
= control target key start
LH: loop header
LB: loop body
LE: loop exit
PB: predicated region body
PF: predicated region fallthrough
CT: control target
= control target key end

     0   :  { %12 = vsyncpa [#allocation3], 0  ;;  %s2152_s24 = smov [#allocation2]   ;;  %s2447_s0 = inlined_call_operand.vmem [shape: f32[2,4,256], index: 0, kind: input, shape index: {}]   ;;  %s2448_s1 = inlined_call_operand.hbm [shape: f32[2,256,128], index: 1, kind: input, shape index: {}]   ;;  %s2449_s2 = inlined_call_operand.vmem [shape: f32[9,1,128], index: 2, kind: input, shape index: {}]   ;;  %s2450_s3 = inlined_call_operand.vmem [shape: f32[9,8,4], index: 3, kind: input, shape index: {}]   ;;  %s2451_s4 = inlined_call_operand.vmem [shape: f32[8,1], index: 4, kind: input, shape index: {}]   ;;  %s2452_s5 = inlined_call_operand.vmem [shape: f32[9,8,8], index: 5, kind: input, shape index: {}]   ;;  %s2453_s6 = inlined_call_operand.vmem [shape: f32[8,1], index: 6, kind: input, shape index: {}]   ;;  %s2454_s7 = inlined_call_operand.vmem [shape: f32[8,128], index: 7, kind: output, shape index: {}]  }
   0x1   :  { %s20_s25 = sshll.u32 %s2152_s24, 4  ;;  %s2128_s28 = scalar_lea.hbm %s2448_s1, 8192  ;;  %s21_s25 = int_to_ptr.vmem [resolvable:$true] %s20_s25 }
   0x2   :  { %p2129_p0 = scmp.ne.s32.totalorder %s2448_s1, %s2128_s28  ;;  %p2132_p1 = scmp.lt.u32.totalorder %s2128_s28, %s2448_s1 }
   0x4   :  { %p2134_p2 = pnand %p2132_p1, %p2129_p0 }
   0x6   :  { %2137 = shalt.err (!%p2134_p2)
}
   0x7   :  { %s2138_s10 = scalar_lea.vmem %s21_s25, 8192  ;;  %p2143_p4 = scmp.lt.s32.totalorder %s21_s25, %s21_s25 }
   0x8   :  { %p2139_p3 = scmp.ne.s32.totalorder %s21_s25, %s2138_s10  ;;  %p2144_p5 = scmp.lt.s32.totalorder %s2138_s10, %s2138_s10 }
   0xa   :  { %p2145_p6 = por %p2144_p5, %p2143_p4 }
   0xc   :  { %p2146_p7 = pnand %p2145_p6, %p2139_p3 }
   0xe   :  { %2149 = shalt.err (!%p2146_p7)
}
   0xf   :  { %s2153_s11 = smov 128   ;;  %s2154_s12 = smov 8  }
  0x10   :  { %26 = dma.hbm_to_vmem [thread:$0]  %s2448_s1, 8192, %s21_s25, [#allocation3], %s2153_s11, %s2153_s11, %s2154_s12  }
  0x11   :  { %2150 = dma.done.wait [#allocation3], 8192  }
  0x12   :  { %2151 = vsyncadd [#allocation3], 4294959104  ;;  %v92_v0 = vld [vmem:[#allocation2 + $0x180] sm:$0xff]  ;;  %v93_v1 = vld [vmem:[#allocation2 + $0x188] sm:$0xff]  ;;  %vm2156_vm0 = vmmov 0   ;;  %s2158_s18 = smov 1  }
  0x13   :  { %v57_v2 = vld [vmem:[#allocation2 + $0x80] sm:$0xff]  ;;  %v2048_v3 = vpack.c.bf16 %v93_v1, %v92_v0  ;;  %v58_v4 = vld [vmem:[#allocation2 + $0x88] sm:$0xff]  ;;  %v94_v11 = vld [vmem:[#allocation2 + $0x190] sm:$0xff]  ;;  %s2159_s19 = smov 9   ;;  %s2160_s20 = smov 121   ;;  %vm282_vm1 = vcmask 1043456  }
  0x14   :  { %v76_v5 = vld [vmem:[#allocation2 + $0x100] sm:$0xff]  ;;  %v77_v6 = vld [vmem:[#allocation2 + $0x108] sm:$0xff]  ;;  %v2080_v7 = vpack.c.bf16 %v58_v4, %v57_v2  ;;  %v95_v13 = vld [vmem:[#allocation2 + $0x198] sm:$0xff]  ;;  %s2161_s21 = smov 127   ;;  %s2163_s22 = smov 119   ;;  %vm278_vm2 = vcmask 31744  }
  0x15   :  { %v2050_v8 = vpack.c.bf16 %v77_v6, %v76_v5  ;;  %v41_v9 = vld [vmem:[#allocation2] sm:$0xff]  ;;  %v42_v10 = vld [vmem:[#allocation2 + $0x8] sm:$0xff]  ;;  %2049 = vmatprep.subr.bf16.mxu0 %v2048_v3  ;;  %v59_v14 = vld [vmem:[#allocation2 + $0x90] sm:$0xff]  ;;  %v2052_v16 = vpack.c.bf16 %v95_v13, %v94_v11  ;;  %s2164_s23 = smov 120   ;;  %vm1078_vm3 = vcmask 64512  }
  0x16   :  { %v2082_v12 = vpack.c.bf16 %v42_v10, %v41_v9  ;;  %v60_v15 = vld [vmem:[#allocation2 + $0x98] sm:$0xff]  ;;  %2081 = vmatprep.subr.bf16.mxu1 %v2080_v7  ;;  %v78_v18 = vld [vmem:[#allocation2 + $0x110] sm:$0xff]  ;;  %v96_v23 = vld [vmem:[#allocation2 + $0x1a0] sm:$0xff] }
  0x17   :  { %2051 = vmatpush3.bf16.msra.mxu0 %v2050_v8  ;;  %v2084_v17 = vpack.c.bf16 %v60_v15, %v59_v14  ;;  %v79_v19 = vld [vmem:[#allocation2 + $0x118] sm:$0xff]  ;;  %v43_v20 = vld [vmem:[#allocation2 + $0x10] sm:$0xff]  ;;  %v97_v24 = vld [vmem:[#allocation2 + $0x1a8] sm:$0xff] }
  0x18   :  { %2083 = vmatpush3.bf16.msra.mxu1 %v2082_v12  ;;  %v2054_v21 = vpack.c.bf16 %v79_v19, %v78_v18  ;;  %v44_v22 = vld [vmem:[#allocation2 + $0x18] sm:$0xff]  ;;  %2053 = vmatprep.subr.bf16.mxu0 %v2052_v16  ;;  %v2056_v26 = vpack.c.bf16 %v97_v24, %v96_v23  ;;  %v61_v27 = vld [vmem:[#allocation2 + $0xa0] sm:$0xff]  ;;  %v62_v28 = vld [vmem:[#allocation2 + $0xa8] sm:$0xff] }
  0x19   :  { %2085 = vmatprep.subr.bf16.mxu1 %v2084_v17  ;;  %v2086_v25 = vpack.c.bf16 %v44_v22, %v43_v20  ;;  %v80_v29 = vld [vmem:[#allocation2 + $0x120] sm:$0xff]  ;;  %v2088_v30 = vpack.c.bf16 %v62_v28, %v61_v27  ;;  %v81_v31 = vld [vmem:[#allocation2 + $0x128] sm:$0xff]  ;;  %v98_v35 = vld [vmem:[#allocation2 + $0x1b0] sm:$0xff] }
  0x1a   :  { %v45_v32 = vld [vmem:[#allocation2 + $0x20] sm:$0xff]  ;;  %v46_v33 = vld [vmem:[#allocation2 + $0x28] sm:$0xff]  ;;  %v2058_v34 = vpack.c.bf16 %v81_v31, %v80_v29  ;;  %v99_v36 = vld [vmem:[#allocation2 + $0x1b8] sm:$0xff] }
  0x1b   :  { %2055 = vmatpush3.bf16.msra.mxu0 %v2054_v21  ;;  %v63_v37 = vld [vmem:[#allocation2 + $0xb0] sm:$0xff]  ;;  %v2090_v38 = vpack.c.bf16 %v46_v33, %v45_v32  ;;  %v2060_v39 = vpack.c.bf16 %v99_v36, %v98_v35  ;;  %v64_v40 = vld [vmem:[#allocation2 + $0xb8] sm:$0xff]  ;;  %v100_v46 = vld [vmem:[#allocation2 + $0x1c0] sm:$0xff]  ;;  %v2155_v36 = vmov 0.0  }
  0x1c   :  { %2087 = vmatpush3.bf16.msra.mxu1 %v2086_v25  ;;  %2057 = vmatprep.subr.bf16.mxu0 %v2056_v26  ;;  %v82_v41 = vld [vmem:[#allocation2 + $0x130] sm:$0xff]  ;;  %v83_v42 = vld [vmem:[#allocation2 + $0x138] sm:$0xff]  ;;  %v2092_v43 = vpack.c.bf16 %v64_v40, %v63_v37  ;;  %v101_v47 = vld [vmem:[#allocation2 + $0x1c8] sm:$0xff] }
  0x1d   :  { %2089 = vmatprep.subr.bf16.mxu1 %v2088_v30  ;;  %v47_v44 = vld [vmem:[#allocation2 + $0x30] sm:$0xff]  ;;  %v48_v45 = vld [vmem:[#allocation2 + $0x38] sm:$0xff]  ;;  %v65_v48 = vld [vmem:[#allocation2 + $0xc0] sm:$0xff]  ;;  %v2062_v50 = vpack.c.bf16 %v83_v42, %v82_v41  ;;  %v2064_v52 = vpack.c.bf16 %v101_v47, %v100_v46 }
  0x1e   :  { %v66_v49 = vld [vmem:[#allocation2 + $0xc8] sm:$0xff]  ;;  %v2094_v51 = vpack.c.bf16 %v48_v45, %v47_v44  ;;  %v84_v53 = vld [vmem:[#allocation2 + $0x140] sm:$0xff]  ;;  %v102_v58 = vld [vmem:[#allocation2 + $0x1d0] sm:$0xff]  ;;  %v2162_v44 = vmov 0  }
  0x1f   :  { %2059 = vmatpush3.bf16.msra.mxu0 %v2058_v34  ;;  %v85_v54 = vld [vmem:[#allocation2 + $0x148] sm:$0xff]  ;;  %v49_v55 = vld [vmem:[#allocation2 + $0x40] sm:$0xff]  ;;  %v2096_v56 = vpack.c.bf16 %v66_v49, %v65_v48  ;;  %v103_v59 = vld [vmem:[#allocation2 + $0x1d8] sm:$0xff]  ;;  %2125 = vset.pattern.permute.xlu0 %v2162_v44 }
  0x20   :  { %2091 = vmatpush3.bf16.msra.mxu1 %v2090_v38  ;;  %2061 = vmatprep.subr.bf16.mxu0 %v2060_v39  ;;  %v50_v57 = vld [vmem:[#allocation2 + $0x48] sm:$0xff]  ;;  %v67_v60 = vld [vmem:[#allocation2 + $0xd0] sm:$0xff]  ;;  %v68_v61 = vld [vmem:[#allocation2 + $0xd8] sm:$0xff]  ;;  %v2066_v62 = vpack.c.bf16 %v85_v54, %v84_v53  ;;  %v2068_v0 = vpack.c.bf16 %v103_v59, %v102_v58 }
  0x21   :  { %2093 = vmatprep.subr.bf16.mxu1 %v2092_v43  ;;  %v2098_v63 = vpack.c.bf16 %v50_v57, %v49_v55  ;;  %v86_v1 = vld [vmem:[#allocation2 + $0x150] sm:$0xff]  ;;  %v87_v2 = vld [vmem:[#allocation2 + $0x158] sm:$0xff]  ;;  %v2100_v4 = vpack.c.bf16 %v68_v61, %v67_v60  ;;  %v104_v6 = vld [vmem:[#allocation2 + $0x1e0] sm:$0xff] }
  0x22   :  { %v51_v3 = vld [vmem:[#allocation2 + $0x50] sm:$0xff]  ;;  %v52_v5 = vld [vmem:[#allocation2 + $0x58] sm:$0xff]  ;;  %v105_v7 = vld [vmem:[#allocation2 + $0x1e8] sm:$0xff]  ;;  %v2070_v10 = vpack.c.bf16 %v87_v2, %v86_v1 }
  0x23   :  { %2063 = vmatpush3.bf16.msra.mxu0 %v2062_v50  ;;  %v69_v8 = vld [vmem:[#allocation2 + $0xe0] sm:$0xff]  ;;  %v70_v9 = vld [vmem:[#allocation2 + $0xe8] sm:$0xff]  ;;  %v2102_v13 = vpack.c.bf16 %v52_v5, %v51_v3  ;;  %v2072_v14 = vpack.c.bf16 %v105_v7, %v104_v6  ;;  %v106_v20 = vld [vmem:[#allocation2 + $0x1f0] sm:$0xff] }
  0x24   :  { %2095 = vmatpush3.bf16.msra.mxu1 %v2094_v51  ;;  %2065 = vmatprep.subr.bf16.mxu0 %v2064_v52  ;;  %v88_v11 = vld [vmem:[#allocation2 + $0x160] sm:$0xff]  ;;  %v89_v12 = vld [vmem:[#allocation2 + $0x168] sm:$0xff]  ;;  %v2104_v18 = vpack.c.bf16 %v70_v9, %v69_v8  ;;  %v107_v21 = vld [vmem:[#allocation2 + $0x1f8] sm:$0xff] }
  0x25   :  { %2097 = vmatprep.subr.bf16.mxu1 %v2096_v56  ;;  %v53_v15 = vld [vmem:[#allocation2 + $0x60] sm:$0xff]  ;;  %v1791_v16 = vld [vmem:[%s2447_s0 + $0x8] sm:$0xff]  ;;  %v71_v24 = vld [vmem:[#allocation2 + $0xf0] sm:$0xff]  ;;  %v2074_v26 = vpack.c.bf16 %v89_v12, %v88_v11  ;;  %v2076_v28 = vpack.c.bf16 %v107_v21, %v106_v20 }
  0x26   :  { %v40_v17 = vld [vmem:[%s2447_s0] sm:$0xff]  ;;  %v54_v19 = vld [vmem:[#allocation2 + $0x68] sm:$0xff]  ;;  %v109_v22 = vcombine.high %v1791_v16, %v1791_v16  ;;  %v72_v25 = vld [vmem:[#allocation2 + $0xf8] sm:$0xff]  ;;  %s2157_s0 = smov 7  }
  0x27   :  { %2067 = vmatpush3.bf16.msra.mxu0 %v2066_v62  ;;  %v182_v23 = vcombine.high %v40_v17, %v40_v17  ;;  %v2106_v27 = vpack.c.bf16 %v54_v19, %v53_v15  ;;  %v90_v29 = vld [vmem:[#allocation2 + $0x170] sm:$0xff]  ;;  %v91_v30 = vld [vmem:[#allocation2 + $0x178] sm:$0xff]  ;;  %v2108_v31 = vpack.c.bf16 %v72_v25, %v71_v24  ;;  %v1060_v45 = vld [vmem:[%s2451_s4] sm:$0xff] }
  0x28   :  { %2099 = vmatpush3.bf16.msra.mxu1 %v2098_v63  ;;  %2069 = vmatprep.subr.bf16.mxu0 %v2068_v0  ;;  %v55_v32 = vld [vmem:[#allocation2 + $0x70] sm:$0xff]  ;;  %v56_v33 = vld [vmem:[#allocation2 + $0x78] sm:$0xff]  ;;  %v2078_v34 = vpack.c.bf16 %v91_v30, %v90_v29  ;;  %v2244_v46 = vld [vmem:[%s2449_s2 + $0x1] ss:$0 sm:$0xff] }
  0x29   :  { %2101 = vmatprep.subr.bf16.mxu1 %v2100_v4  ;;  %175 = vmatprep.mubr.f32.mxu0 %v109_v22  ;;  %v2110_v35 = vpack.c.bf16 %v56_v33, %v55_v32  ;;  %v2249_v47 = vld [vmem:[%s2449_s2 + $0x2] ss:$0 sm:$0xff]  ;;  %v1793_v51 = vld [vmem:[%s2450_s3 + $0x8] sm:$0xff]  ;;  %v2258_v52 = vld [vmem:[%s2449_s2] ss:$0 sm:$0xff] }
  0x2a   :  { %248 = vmatprep.mubr.f32.mxu1 %v182_v23  ;;  %v2267_v56 = vld [vmem:[%s2449_s2 + $0x4] ss:$0 sm:$0xff]  ;;  %v2272_v57 = vld [vmem:[%s2449_s2 + $0x3] ss:$0 sm:$0xff]  ;;  %v1800_v60 = vld [vmem:[%s2450_s3 + $0x10] sm:$0xff] }
  0x2b   :  { %2071 = vmatpush3.bf16.msra.mxu0 %v2070_v10  ;;  %v256_v59 = vld [vmem:[%s2450_s3] sm:$0xff]  ;;  %v1805_v4 = vld [vmem:[%s2450_s3 + $0x18] sm:$0xff]  ;;  %v2324_v8 = vld [vmem:[%s2449_s2 + $0x8] ss:$0 sm:$0xff] }
  0x2c   :  { %2103 = vmatpush3.bf16.msra.mxu1 %v2102_v13  ;;  %2073 = vmatprep.subr.bf16.mxu0 %v2072_v14  ;;  %v2288_v61 = vld [vmem:[%s2449_s2 + $0x5] ss:$0 sm:$0xff]  ;;  %v2294_v62 = vld [vmem:[%s2449_s2 + $0x6] ss:$0 sm:$0xff]  ;;  %v2313_v6 = vld [vmem:[%s2449_s2 + $0x7] ss:$0 sm:$0xff] }
  0x2d   :  { %2105 = vmatprep.subr.bf16.mxu1 %v2104_v18  ;;  %v1810_v7 = vld [vmem:[%s2450_s3 + $0x20] sm:$0xff]  ;;  %v1815_v12 = vld [vmem:[%s2450_s3 + $0x28] sm:$0xff]  ;;  %v1820_v14 = vld [vmem:[%s2450_s3 + $0x30] sm:$0xff] }
  0x2e   :  { %v1825_v15 = vld [vmem:[%s2450_s3 + $0x38] sm:$0xff] }
  0x2f   :  { %2075 = vmatpush3.bf16.msra.mxu0 %v2074_v26 }
  0x30   :  { %2107 = vmatpush3.bf16.msra.mxu1 %v2106_v27  ;;  %2077 = vmatprep.subr.bf16.mxu0 %v2076_v28 }
  0x31   :  { %2109 = vmatprep.subr.bf16.mxu1 %v2108_v31 }
  0x33   :  { %2079 = vmatpush3.bf16.msra.mxu0 %v2078_v34 }
  0x34   :  { %2111 = vmatpush3.bf16.msra.mxu1 %v2110_v35  ;;  %1958 = vmatprep.subr.mxu0 %v2155_v36 }
  0x35   :  { %1963 = vmatprep.subr.mxu1 %v2155_v36 }
  0x36   :  { %176 = vmatmul.mubr.f32.vlgmr.msra.gmra.mrb[0].mxu0 %v1791_v16  ;;  %v1830_v16 = vld [vmem:[%s2450_s3 + $0x40] sm:$0xff] }
  0x37   :  { %249 = vmatmul.mubr.f32.vlgmr.msra.gmra.mrb[0].mxu1 %v40_v17  ;;  %1960 = vmatprep.mubr.msk.f32.mxu0 %vm2156_vm0, %v2155_v36 }
  0x38   :  { %1965 = vmatprep.mubr.msk.f32.mxu1 %vm2156_vm0, %v2155_v36 }
 0x109   :  { %v1884_v37 = vpop.f32.mrb[0].mxu0 }
 0x10a   :  { %v1919_v38 = vpop.f32.mrb[0].mxu1  ;;  %v1885_v39 = vpop.f32.mrb[1].mxu0 }
 0x10b   :  { %v1886_v40 = vadd.f32 %v1885_v39, %v1884_v37  ;;  %v1920_v41 = vpop.f32.mrb[1].mxu1 }
 0x10c   :  { %v1921_v42 = vadd.f32 %v1920_v41, %v1919_v38 }
 0x10e   :  { %v251_v43 = vadd.f32 %v1921_v42, %v1886_v40 }
 0x110   :  { %432 = vrot.lane.b32.xlu1 %v251_v43, %s2157_s0  ;;  %265 = vrot.lane.b32.xlu0 %v251_v43, %s2154_s12  ;;  %v622_v63 = vmul.f32 %v2267_v56, %v251_v43 }
 0x114   :  { %522 = vrot.lane.b32.xlu1 %v251_v43, %s2158_s18  ;;  %254 = vrot.lane.b32.xlu0 %v251_v43, %s2159_s19 }
 0x118   :  { %790 = vrot.lane.b32.xlu1 %v251_v43, %s2160_s20  ;;  %700 = vrot.lane.b32.xlu0 %v251_v43, %s2161_s21 }
 0x11c   :  { %970 = vrot.lane.b32.xlu1 %v251_v43, %s2163_s22  ;;  %880 = vrot.lane.b32.xlu0 %v251_v43, %s2164_s23 }
 0x120   :  { %1063 = vperm.xlu0 %2125, %v1060_v45  }
 0x182   :  { %v433_v48 = vpop.permute.xlu1 %432  ;;  %v266_v49 = vpop.permute.xlu0 %265 }
 0x183   :  { %v277_v50 = vmul.f32 %v2244_v46, %v266_v49  ;;  %v444_v53 = vmul.f32 %v2249_v47, %v433_v48 }
 0x185   :  { %1959 = vmatpush3.msk.msra.mxu0 %vm282_vm1, %v277_v50  ;;  %v1776_v50 = vld [vmem:[%s2453_s6] sm:$0xff] }
 0x186   :  { %v523_v54 = vpop.permute.xlu1 %522  ;;  %1961 = vmatmul.mubr.msk.f32.vlgmr.msra.gmra.mrb[2].mxu0 %vm278_vm2, %v1793_v51  ;;  %1968 = vmatprep.subr.mxu0 %v2155_v36  ;;  %v255_v55 = vpop.permute.xlu0 %254 }
 0x187   :  { %v264_v58 = vmul.f32 %v2258_v52, %v255_v55  ;;  %1969 = vmatpush3.msk.msra.mxu0 %vm282_vm1, %v444_v53  ;;  %1970 = vmatprep.mubr.msk.f32.mxu0 %vm2156_vm0, %v2155_v36  ;;  %v534_v0 = vmul.f32 %v2272_v57, %v523_v54  ;;  %v1835_v55 = vld [vmem:[%s2452_s5 + $0x8] sm:$0xff] }
 0x188   :  { %1978 = vmatprep.subr.mxu0 %v2155_v36 }
 0x189   :  { %1964 = vmatpush3.msk.msra.mxu1 %vm282_vm1, %v264_v58 }
 0x18a   :  { %v791_v1 = vpop.permute.xlu1 %790  ;;  %1966 = vmatmul.mubr.msk.f32.vlgmr.msra.gmra.mrb[2].mxu1 %vm278_vm2, %v256_v59  ;;  %1971 = vmatmul.mubr.msk.f32.vlgmr.msra.gmra.mrb[4].mxu0 %vm278_vm2, %v1800_v60  ;;  %v701_v2 = vpop.permute.xlu0 %700 }
 0x18b   :  { %1973 = vmatprep.subr.mxu1 %v2155_v36  ;;  %v712_v3 = vmul.f32 %v2288_v61, %v701_v2  ;;  %1979 = vmatpush3.msk.msra.mxu0 %vm282_vm1, %v622_v63  ;;  %v802_v5 = vmul.f32 %v2294_v62, %v791_v1  ;;  %v1840_v2 = vld [vmem:[%s2452_s5 + $0x18] sm:$0xff] }
 0x18c   :  { %1974 = vmatpush3.msk.msra.mxu1 %vm282_vm1, %v534_v0  ;;  %1975 = vmatprep.mubr.msk.f32.mxu1 %vm2156_vm0, %v2155_v36 }
 0x18d   :  { %1980 = vmatprep.mubr.msk.f32.mxu0 %vm2156_vm0, %v2155_v36  ;;  %1983 = vmatprep.subr.mxu1 %v2155_v36 }
 0x18e   :  { %1988 = vmatprep.subr.mxu0 %v2155_v36  ;;  %v971_v9 = vpop.permute.xlu1 %970  ;;  %1976 = vmatmul.mubr.msk.f32.vlgmr.msra.gmra.mrb[4].mxu1 %vm278_vm2, %v1805_v4  ;;  %v881_v10 = vpop.permute.xlu0 %880 }
 0x18f   :  { %1984 = vmatpush3.msk.msra.mxu1 %vm282_vm1, %v712_v3  ;;  %v892_v11 = vmul.f32 %v2313_v6, %v881_v10  ;;  %1981 = vmatmul.mubr.msk.f32.vlgmr.msra.gmra.mrb[6].mxu0 %vm278_vm2, %v1810_v7  ;;  %v982_v13 = vmul.f32 %v2324_v8, %v971_v9  ;;  %v1844_v7 = vld [vmem:[%s2452_s5 + $0x28] sm:$0xff] }
 0x190   :  { %1989 = vmatpush3.msk.msra.mxu0 %vm282_vm1, %v802_v5  ;;  %1985 = vmatprep.mubr.msk.f32.mxu1 %vm2156_vm0, %v2155_v36 }
 0x191   :  { %1990 = vmatprep.mubr.msk.f32.mxu0 %vm2156_vm0, %v2155_v36  ;;  %1993 = vmatprep.subr.mxu1 %v2155_v36 }
 0x192   :  { %1998 = vmatprep.subr.mxu0 %v2155_v36  ;;  %1986 = vmatmul.mubr.msk.f32.vlgmr.msra.gmra.mrb[6].mxu1 %vm278_vm2, %v1815_v12 }
 0x193   :  { %1991 = vmatmul.mubr.msk.f32.vlgmr.msra.gmra.mrb[8].mxu0 %vm278_vm2, %v1820_v14  ;;  %1994 = vmatpush3.msk.msra.mxu1 %vm282_vm1, %v892_v11  ;;  %v1848_v11 = vld [vmem:[%s2452_s5 + $0x38] sm:$0xff] }
 0x194   :  { %1999 = vmatpush3.msk.msra.mxu0 %vm282_vm1, %v982_v13  ;;  %1995 = vmatprep.mubr.msk.f32.mxu1 %vm2156_vm0, %v2155_v36 }
 0x195   :  { %2000 = vmatprep.mubr.msk.f32.mxu0 %vm2156_vm0, %v2155_v36  ;;  %2003 = vmatprep.subr.mxu1 %v2155_v36 }
 0x196   :  { %1996 = vmatmul.mubr.msk.f32.vlgmr.msra.gmra.mrb[8].mxu1 %vm278_vm2, %v1825_v15  ;;  %2008 = vmatprep.subr.mxu0 %v2155_v36 }
 0x197   :  { %2001 = vmatmul.mubr.msk.f32.vlgmr.msra.gmra.mrb[10].mxu0 %vm278_vm2, %v1830_v16  ;;  %2005 = vmatprep.mubr.msk.f32.mxu1 %vm2156_vm0, %v2155_v36 }
 0x198   :  { %2010 = vmatprep.mubr.msk.f32.mxu0 %vm2156_vm0, %v2155_v36 }
 0x19f   :  { %v1064_v43 = vpop.permute.xlu0 %1063 }
 0x259   :  { %v352_v17 = vpop.f32.mrb[2].mxu0 }
 0x25a   :  { %v1962_v18 = vpop.f32.mrb[3].mxu0 }
 0x25d   :  { %v428_v19 = vpop.f32.mrb[2].mxu1  ;;  %v517_v20 = vpop.f32.mrb[4].mxu0 }
 0x25e   :  { %v429_v21 = vadd.f32 %v428_v19, %v352_v17  ;;  %v1967_v22 = vpop.f32.mrb[3].mxu1  ;;  %v1972_v23 = vpop.f32.mrb[5].mxu0 }
 0x260   :  { %v521_v24 = vadd.f32 %v517_v20, %v429_v21 }
 0x261   :  { %v607_v25 = vpop.f32.mrb[4].mxu1 }
 0x262   :  { %v611_v26 = vadd.f32 %v607_v25, %v521_v24  ;;  %v1977_v27 = vpop.f32.mrb[5].mxu1  ;;  %v695_v28 = vpop.f32.mrb[6].mxu0 }
 0x263   :  { %v1982_v29 = vpop.f32.mrb[7].mxu0 }
 0x264   :  { %v699_v30 = vadd.f32 %v695_v28, %v611_v26 }
 0x265   :  { %v785_v31 = vpop.f32.mrb[6].mxu1 }
 0x266   :  { %v789_v32 = vadd.f32 %v785_v31, %v699_v30  ;;  %v1987_v33 = vpop.f32.mrb[7].mxu1  ;;  %v875_v34 = vpop.f32.mrb[8].mxu0 }
 0x267   :  { %v1992_v35 = vpop.f32.mrb[9].mxu0 }
 0x268   :  { %v879_v37 = vadd.f32 %v875_v34, %v789_v32 }
 0x269   :  { %v965_v38 = vpop.f32.mrb[8].mxu1 }
 0x26a   :  { %v969_v39 = vadd.f32 %v965_v38, %v879_v37  ;;  %v1997_v40 = vpop.f32.mrb[9].mxu1  ;;  %v1055_v41 = vpop.f32.mrb[10].mxu0 }
 0x26b   :  { %v2002_v42 = vpop.f32.mrb[11].mxu0 }
 0x26c   :  { %v1059_v44 = vadd.f32 %v1055_v41, %v969_v39 }
 0x26e   :  { %v1066_v45 = vadd.f32 %v1064_v43, %v1059_v44 }
 0x270   :  { %v1067_v48 = vmul.f32 0.1, %v1066_v45 }
 0x272   :  { %v1068_v49 = vmax.f32 %v1066_v45, %v1067_v48 }
 0x274   :  { %1225 = vrot.lane.b32.xlu0 %v1068_v49, %s2157_s0  ;;  %1073 = vrot.lane.b32.xlu1 %v1068_v49, %s2154_s12  ;;  %v1385_v0 = vmul.f32 %v2267_v56, %v1068_v49  ;;  %v1842_v56 = vld [vmem:[%s2452_s5 + $0x20] sm:$0xff] }
 0x278   :  { %1460 = vrot.lane.b32.xlu0 %v1068_v49, %s2161_s21  ;;  %1069 = vrot.lane.b32.xlu1 %v1068_v49, %s2159_s19 }
 0x27c   :  { %1618 = vrot.lane.b32.xlu0 %v1068_v49, %s2164_s23  ;;  %1304 = vrot.lane.b32.xlu1 %v1068_v49, %s2158_s18 }
 0x280   :  { %1779 = vperm.xlu0 %2125, %v1776_v50   ;;  %1539 = vrot.lane.b32.xlu1 %v1068_v49, %s2160_s20 }
 0x284   :  { %1697 = vrot.lane.b32.xlu1 %v1068_v49, %s2163_s22 }
 0x2e6   :  { %v1226_v51 = vpop.permute.xlu0 %1225  ;;  %v1074_v53 = vpop.permute.xlu1 %1073 }
 0x2e7   :  { %v1077_v54 = vmul.f32 %v2244_v46, %v1074_v53  ;;  %v1229_v58 = vmul.f32 %v2249_v47, %v1226_v51  ;;  %v1071_v46 = vld [vmem:[%s2452_s5] sm:$0xff]  ;;  %v1838_v47 = vld [vmem:[%s2452_s5 + $0x10] sm:$0xff] }
 0x2e9   :  { %2004 = vmatpush3.msra.mxu1 %v1077_v54 }
 0x2ea   :  { %2006 = vmatmul.mubr.msk.f32.vlgmr.msra.gmra.mrb[10].mxu1 %vm1078_vm3, %v1835_v55  ;;  %2013 = vmatprep.subr.mxu1 %v2155_v36  ;;  %v1070_v59 = vpop.permute.xlu1 %1069  ;;  %v1461_v63 = vpop.permute.xlu0 %1460 }
 0x2eb   :  { %v1072_v60 = vmul.f32 %v2258_v52, %v1070_v59  ;;  %2014 = vmatpush3.msra.mxu1 %v1229_v58  ;;  %2015 = vmatprep.mubr.msk.f32.mxu1 %vm2156_vm0, %v2155_v36  ;;  %v1464_v3 = vmul.f32 %v2288_v61, %v1461_v63  ;;  %v1846_v61 = vld [vmem:[%s2452_s5 + $0x30] sm:$0xff] }
 0x2ec   :  { %2023 = vmatprep.subr.mxu1 %v2155_v36 }
 0x2ed   :  { %2009 = vmatpush3.msra.mxu0 %v1072_v60 }
 0x2ee   :  { %2011 = vmatmul.mubr.msk.f32.vlgmr.msra.gmra.mrb[12].mxu0 %vm1078_vm3, %v1071_v46  ;;  %2016 = vmatmul.mubr.msk.f32.vlgmr.msra.gmra.mrb[12].mxu1 %vm1078_vm3, %v1838_v47  ;;  %v1305_v52 = vpop.permute.xlu1 %1304 }
 0x2ef   :  { %v1308_v1 = vmul.f32 %v2272_v57, %v1305_v52  ;;  %2024 = vmatpush3.msra.mxu1 %v1385_v0  ;;  %2018 = vmatprep.subr.mxu0 %v2155_v36  ;;  %v1619_v57 = vpop.permute.xlu0 %1618 }
 0x2f0   :  { %2020 = vmatprep.mubr.msk.f32.mxu0 %vm2156_vm0, %v2155_v36  ;;  %2025 = vmatprep.mubr.msk.f32.mxu1 %vm2156_vm0, %v2155_v36  ;;  %v1622_v9 = vmul.f32 %v2313_v6, %v1619_v57  ;;  %v1850_v6 = vld [vmem:[%s2452_s5 + $0x40] sm:$0xff] }
 0x2f1   :  { %2019 = vmatpush3.msra.mxu0 %v1308_v1  ;;  %2033 = vmatprep.subr.mxu1 %v2155_v36 }
 0x2f2   :  { %2021 = vmatmul.mubr.msk.f32.vlgmr.msra.gmra.mrb[14].mxu0 %vm1078_vm3, %v1840_v2  ;;  %2028 = vmatprep.subr.mxu0 %v2155_v36  ;;  %v1540_v4 = vpop.permute.xlu1 %1539 }
 0x2f3   :  { %v1543_v5 = vmul.f32 %v2294_v62, %v1540_v4  ;;  %2029 = vmatpush3.msra.mxu0 %v1464_v3  ;;  %2026 = vmatmul.mubr.msk.f32.vlgmr.msra.gmra.mrb[14].mxu1 %vm1078_vm3, %v1842_v56 }
 0x2f4   :  { %2030 = vmatprep.mubr.msk.f32.mxu0 %vm2156_vm0, %v2155_v36  ;;  %2038 = vmatprep.subr.mxu0 %v2155_v36 }
 0x2f5   :  { %2034 = vmatpush3.msra.mxu1 %v1543_v5  ;;  %2035 = vmatprep.mubr.msk.f32.mxu1 %vm2156_vm0, %v2155_v36 }
 0x2f6   :  { %2031 = vmatmul.mubr.msk.f32.vlgmr.msra.gmra.mrb[16].mxu0 %vm1078_vm3, %v1844_v7  ;;  %v1698_v62 = vpop.permute.xlu1 %1697  ;;  %2043 = vmatprep.subr.mxu1 %v2155_v36 }
 0x2f7   :  { %2039 = vmatpush3.msra.mxu0 %v1622_v9  ;;  %v1701_v10 = vmul.f32 %v2324_v8, %v1698_v62  ;;  %2036 = vmatmul.mubr.msk.f32.vlgmr.msra.gmra.mrb[16].mxu1 %vm1078_vm3, %v1846_v61 }
 0x2f8   :  { %2040 = vmatprep.mubr.msk.f32.mxu0 %vm2156_vm0, %v2155_v36  ;;  %2045 = vmatprep.mubr.msk.f32.mxu1 %vm2156_vm0, %v2155_v36 }
 0x2f9   :  { %2044 = vmatpush3.msra.mxu1 %v1701_v10 }
 0x2fa   :  { %2041 = vmatmul.mubr.msk.f32.vlgmr.msra.gmra.mrb[18].mxu0 %vm1078_vm3, %v1848_v11 }
 0x2fb   :  { %2046 = vmatmul.mubr.msk.f32.vlgmr.msra.gmra.mrb[18].mxu1 %vm1078_vm3, %v1850_v6 }
 0x2ff   :  { %v1780_v37 = vpop.permute.xlu0 %1779 }
 0x3bd   :  { %v1148_v8 = vpop.f32.mrb[10].mxu1 }
 0x3be   :  { %v2007_v12 = vpop.f32.mrb[11].mxu1 }
 0x3c1   :  { %v1221_v13 = vpop.f32.mrb[12].mxu0  ;;  %v1299_v14 = vpop.f32.mrb[12].mxu1 }
 0x3c2   :  { %v1222_v15 = vadd.f32 %v1221_v13, %v1148_v8  ;;  %v2012_v16 = vpop.f32.mrb[13].mxu0  ;;  %v2017_v17 = vpop.f32.mrb[13].mxu1 }
 0x3c4   :  { %v1303_v18 = vadd.f32 %v1299_v14, %v1222_v15 }
 0x3c5   :  { %v1378_v19 = vpop.f32.mrb[14].mxu0 }
 0x3c6   :  { %v1382_v20 = vadd.f32 %v1378_v19, %v1303_v18  ;;  %v1455_v36 = vpop.f32.mrb[14].mxu1  ;;  %v2022_v21 = vpop.f32.mrb[15].mxu0 }
 0x3c7   :  { %v2027_v22 = vpop.f32.mrb[15].mxu1 }
 0x3c8   :  { %v1459_v23 = vadd.f32 %v1455_v36, %v1382_v20 }
 0x3c9   :  { %v1534_v24 = vpop.f32.mrb[16].mxu0 }
 0x3ca   :  { %v1538_v25 = vadd.f32 %v1534_v24, %v1459_v23  ;;  %v1613_v26 = vpop.f32.mrb[16].mxu1  ;;  %v2032_v27 = vpop.f32.mrb[17].mxu0 }
 0x3cb   :  { %v2037_v28 = vpop.f32.mrb[17].mxu1 }
 0x3cc   :  { %v1617_v29 = vadd.f32 %v1613_v26, %v1538_v25 }
 0x3cd   :  { %v1692_v30 = vpop.f32.mrb[18].mxu0 }
 0x3ce   :  { %v1696_v31 = vadd.f32 %v1692_v30, %v1617_v29  ;;  %v1771_v32 = vpop.f32.mrb[18].mxu1  ;;  %v2042_v33 = vpop.f32.mrb[19].mxu0 }
 0x3cf   :  { %v2047_v34 = vpop.f32.mrb[19].mxu1 }
 0x3d0   :  { %v1775_v35 = vadd.f32 %v1771_v32, %v1696_v31 }
 0x3d2   :  { %v1782_v38 = vadd.f32 %v1780_v37, %v1775_v35 }
 0x3d4   :  { %v1783_v39 = vmul.f32 0.1, %v1782_v38 }
 0x3d6   :  { %v1784_v40 = vmax.f32 %v1782_v38, %v1783_v39 }
 0x3d8   :  { %1785 = vst [vmem:[%s2454_s7] sm:$0xff] %v1784_v40 }
 0x3d9   :  { %1790 = vsyncpa [#allocation3], 1 }

</bundles_post_ra>
